<compile_context>
chip_gen: v6e
topology: v6e:2x2x1
jax: 0.10.0
libtpu: 0.0.40
codegen_flags: <defaults>
</compile_context>

<pallas_src>
import functools

import jax
import jax.numpy as jnp
from jax.experimental import pallas as pl
from jax.experimental.pallas import tpu as pltpu


def _mlp_diffusion_kernel(x_ref, idx_ref, slab_ref, out_ref, *,
                          offsets, n_steps, num_driver, U):
    B = x_ref.shape[0]

    x = x_ref[...]                                 # (B, 2) f32
    t_idx = idx_ref[:, 0:1]                        # (B, 1) int32
    d_idx = idx_ref[:, 1:2]                        # (B, 1) int32

    # --- In-kernel embedding gathers as one-hot matmuls (exact: 0/1 weights).
    # Each dot hits a lane-aligned (n, U) slab segment and produces a
    # lane-aligned (B, U) result -> no lane-offset slicing afterwards.
    t_oh = (jax.lax.broadcasted_iota(jnp.int32, (B, n_steps), 1) == t_idx
            ).astype(jnp.float32)                  # (B, n_steps)
    d_oh = (jax.lax.broadcasted_iota(jnp.int32, (B, num_driver), 1) == d_idx
            ).astype(jnp.float32)                  # (B, num_driver)

    o = offsets
    se0 = jnp.dot(t_oh, slab_ref[o["step0"]:o["step0"] + n_steps, :],
                  preferred_element_type=jnp.float32)      # (B, U) (+b0 folded)
    se1 = jnp.dot(t_oh, slab_ref[o["step1"]:o["step1"] + n_steps, :],
                  preferred_element_type=jnp.float32)      # (B, U) (+b1 folded)
    se2 = jnp.dot(t_oh, slab_ref[o["step2"]:o["step2"] + n_steps, :],
                  preferred_element_type=jnp.float32)      # (B, U) (+b2 folded)
    drv_e = jnp.dot(d_oh, slab_ref[o["drv"]:o["drv"] + num_driver, :],
                    preferred_element_type=jnp.float32)    # (B, U)

    w_small = slab_ref[o["small"]:o["small"] + 5, :]       # (5, U)
    w0 = w_small[0:2, :]                                   # (2, U)
    w3t = w_small[2:4, :]                                  # (2, U) == W3^T
    b3row = w_small[4:5, :]                                # (1, U), b3 in lanes 0:2

    # --- Block 0: Linear(2 -> U) on the VPU (K=2 MXU op is pure latency),
    #     + step_emb0 (+b0 folded) + driver_emb, ReLU.
    h = (x[:, 0:1] * w0[0:1, :] + x[:, 1:2] * w0[1:2, :] + se0 + drv_e)
    h = jnp.maximum(h, 0.0)

    # --- Block 1: Linear(U -> U) + step_emb1 (+b1 folded), ReLU.
    h = jnp.dot(h, slab_ref[o["w1"]:o["w1"] + U, :],
                preferred_element_type=jnp.float32) + se1
    h = jnp.maximum(h, 0.0)

    # --- Block 2: Linear(U -> U) + step_emb2 (+b2 folded), ReLU.
    h = jnp.dot(h, slab_ref[o["w2"]:o["w2"] + U, :],
                preferred_element_type=jnp.float32) + se2
    h = jnp.maximum(h, 0.0)

    # --- Final Linear(U -> 2): broadcast-mul + lane reductions on VPU/XLU,
    #     written straight into the output columns (no lane concatenate).
    o0 = jnp.sum(h * w3t[0:1, :], axis=-1, keepdims=True) + b3row[:, 0:1]
    o1 = jnp.sum(h * w3t[1:2, :], axis=-1, keepdims=True) + b3row[:, 1:2]
    out_ref[:, 0:1] = o0.astype(out_ref.dtype)
    out_ref[:, 1:2] = o1.astype(out_ref.dtype)


def pack_params(params):
    """One-time parameter packing into a single lane-dense (R, U) slab."""
    (w0, b0, w1, b1, w2, b2, w3, b3,
     step_emb0, step_emb1, step_emb2, drv_emb0) = params
    U = w0.shape[1]
    n_steps = step_emb0.shape[0]
    num_driver = drv_emb0.shape[0]

    def pad8(a):
        r = (-a.shape[0]) % 8
        if r:
            a = jnp.concatenate(
                [a, jnp.zeros((r, a.shape[1]), a.dtype)], axis=0)
        return a

    b3_row = jnp.zeros((1, U), jnp.float32).at[0, :2].set(b3)
    segments = [
        ("step0", pad8(step_emb0 + b0[None, :])),            # biases folded
        ("step1", pad8(step_emb1 + b1[None, :])),
        ("step2", pad8(step_emb2 + b2[None, :])),
        ("drv",   pad8(drv_emb0)),
        ("small", pad8(jnp.concatenate([w0, w3.T, b3_row], axis=0))),
        ("w1",    pad8(w1)),
        ("w2",    pad8(w2)),
    ]
    offsets, off = {}, 0
    for name, seg in segments:
        offsets[name] = off
        off += seg.shape[0]
    slab = jnp.concatenate([seg for _, seg in segments], axis=0)  # (R, U) f32
    meta = dict(offsets=offsets, n_steps=n_steps,
                num_driver=num_driver, U=U)
    return slab, meta


def mlp_diffusion_forward(x, t, d, packed):
    """x: (B, 2) f32, t: (B,) int32, d: (B,) int32, packed: pack_params(...)."""
    slab, meta = packed
    B = x.shape[0]
    U = meta["U"]
    n_steps = meta["n_steps"]
    num_driver = meta["num_driver"]

    idx = jnp.stack([t, d], axis=1).astype(jnp.int32)       # (B, 2)

    kernel = functools.partial(
        _mlp_diffusion_kernel,
        offsets=meta["offsets"], n_steps=n_steps,
        num_driver=num_driver, U=U)

    vmem = pl.BlockSpec(memory_space=pltpu.MemorySpace.VMEM)

    flops = 2 * B * (n_steps * 3 * U        # one-hot step gathers
                     + num_driver * U       # one-hot driver gather
                     + 2 * U                # layer 0 (VPU)
                     + 2 * U * U            # layers 1, 2 (MXU)
                     + U * 2)               # final projection (VPU/XLU)
    bytes_accessed = 4 * (x.size + idx.size + slab.size + B * 2)

    return pl.pallas_call(
        kernel,
        out_shape=jax.ShapeDtypeStruct((B, 2), jnp.float32),
        in_specs=[vmem, vmem, vmem],
        out_specs=vmem,
        cost_estimate=pl.CostEstimate(
            flops=int(flops), transcendentals=0,
            bytes_accessed=int(bytes_accessed)),
    )(x, idx, slab)


def init_params(key, n_steps, num_driver, num_units):
    ks = jax.random.split(key, 12)

    def linear(kw, kb, fan_in, fan_out):
        bound = 1.0 / jnp.sqrt(fan_in)
        w = jax.random.uniform(kw, (fan_in, fan_out), jnp.float32, -bound, bound)
        b = jax.random.uniform(kb, (fan_out,), jnp.float32, -bound, bound)
        return w, b

    w0, b0 = linear(ks[0], ks[1], 2, num_units)
    w1, b1 = linear(ks[2], ks[3], num_units, num_units)
    w2, b2 = linear(ks[4], ks[5], num_units, num_units)
    w3, b3 = linear(ks[6], ks[7], num_units, 2)
    step_emb0 = jax.random.normal(ks[8], (n_steps, num_units), jnp.float32)
    step_emb1 = jax.random.normal(ks[9], (n_steps, num_units), jnp.float32)
    step_emb2 = jax.random.normal(ks[10], (n_steps, num_units), jnp.float32)
    drv_emb0 = jax.random.normal(ks[11], (num_driver, num_units), jnp.float32)
    return (w0, b0, w1, b1, w2, b2, w3, b3,
            step_emb0, step_emb1, step_emb2, drv_emb0)


def reference_forward(x, t, d, params):
    (w0, b0, w1, b1, w2, b2, w3, b3,
     step_emb0, step_emb1, step_emb2, drv_emb0) = params
    h = x @ w0 + b0 + step_emb0[t] + drv_emb0[d]
    h = jnp.maximum(h, 0.0)
    h = h @ w1 + b1 + step_emb1[t]
    h = jnp.maximum(h, 0.0)
    h = h @ w2 + b2 + step_emb2[t]
    h = jnp.maximum(h, 0.0)
    return h @ w3 + b3


if __name__ == "__main__":
    B = 8
    N_STEPS = 16
    NUM_DRIVER = 64     # small stand-in for DRIVER_NUM=1000
    NUM_UNITS = 32      # DRIVER_SIZE

    key = jax.random.PRNGKey(0)
    k_p, k_x, k_t, k_d = jax.random.split(key, 4)

    params = init_params(k_p, N_STEPS, NUM_DRIVER, NUM_UNITS)
    packed = pack_params(params)

    x = jax.random.normal(k_x, (B, 2), jnp.float32)
    t = jax.random.randint(k_t, (B,), 0, N_STEPS, jnp.int32)
    d = jax.random.randint(k_d, (B,), 0, NUM_DRIVER, jnp.int32)

    out = mlp_diffusion_forward(x, t, d, packed)
    out = jax.block_until_ready(out)

    ref = reference_forward(x, t, d, params)
    assert out.shape == (B, 2)
    assert jnp.allclose(out, ref, atol=1e-5, rtol=1e-5)
    print("KERNEL_OK")
</pallas_src>

<mosaic_0001>
module attributes {stable_mosaic.version = 11 : i64} {
  func.func @_mlp_diffusion_kernel(%arg0: memref<8x2xf32, #tpu.memory_space<vmem>>, %arg1: memref<8x2xi32, #tpu.memory_space<vmem>>, %arg2: memref<184x32xf32, #tpu.memory_space<vmem>>, %arg3: memref<8x2xf32, #tpu.memory_space<vmem>>) attributes {dimension_semantics = [], scalar_prefetch = 0 : i64, scratch_operands = 0 : i64, tpu.core_type = #tpu.core_type<tc>} {
    %c0 = arith.constant 0 : index
    %c0_0 = arith.constant 0 : index
    %0 = vector.load %arg0[%c0, %c0_0] : memref<8x2xf32, #tpu.memory_space<vmem>>, vector<8x2xf32>
    %c0_1 = arith.constant 0 : index
    %c0_2 = arith.constant 0 : index
    %1 = vector.load %arg1[%c0_1, %c0_2] : memref<8x2xi32, #tpu.memory_space<vmem>>, vector<8x1xi32>
    %c0_3 = arith.constant 0 : index
    %c1 = arith.constant 1 : index
    %2 = vector.load %arg1[%c0_3, %c1] : memref<8x2xi32, #tpu.memory_space<vmem>>, vector<8x1xi32>
    %3 = tpu.iota {dimensions = array<i32: 1>} : vector<8x16xi32>
    %4 = vector.broadcast %1 : vector<8x1xi32> to vector<8x16xi32>
    %5 = arith.cmpi eq, %3, %4 : vector<8x16xi32>
    %6 = arith.extui %5 : vector<8x16xi1> to vector<8x16xi32>
    %7 = arith.sitofp %6 : vector<8x16xi32> to vector<8x16xf32>
    %8 = tpu.iota {dimensions = array<i32: 1>} : vector<8x64xi32>
    %9 = vector.broadcast %2 : vector<8x1xi32> to vector<8x64xi32>
    %10 = arith.cmpi eq, %8, %9 : vector<8x64xi32>
    %11 = arith.extui %10 : vector<8x64xi1> to vector<8x64xi32>
    %12 = arith.sitofp %11 : vector<8x64xi32> to vector<8x64xf32>
    %c0_4 = arith.constant 0 : index
    %c0_5 = arith.constant 0 : index
    %13 = vector.load %arg2[%c0_4, %c0_5] : memref<184x32xf32, #tpu.memory_space<vmem>>, vector<16x32xf32>
    %cst = arith.constant dense<0.000000e+00> : vector<8x32xf32>
    %14 = tpu.matmul %7, %13, %cst {dimension_numbers = #tpu.dot_dimension_numbers<[1], [0], [0], [1], [0, 0, 1, 1], [], []>} : vector<8x16xf32>, vector<16x32xf32>, vector<8x32xf32> -> vector<8x32xf32>
    %c16 = arith.constant 16 : index
    %c0_6 = arith.constant 0 : index
    %15 = vector.load %arg2[%c16, %c0_6] : memref<184x32xf32, #tpu.memory_space<vmem>>, vector<16x32xf32>
    %cst_7 = arith.constant dense<0.000000e+00> : vector<8x32xf32>
    %16 = tpu.matmul %7, %15, %cst_7 {dimension_numbers = #tpu.dot_dimension_numbers<[1], [0], [0], [1], [0, 0, 1, 1], [], []>} : vector<8x16xf32>, vector<16x32xf32>, vector<8x32xf32> -> vector<8x32xf32>
    %c32 = arith.constant 32 : index
    %c0_8 = arith.constant 0 : index
    %17 = vector.load %arg2[%c32, %c0_8] : memref<184x32xf32, #tpu.memory_space<vmem>>, vector<16x32xf32>
    %cst_9 = arith.constant dense<0.000000e+00> : vector<8x32xf32>
    %18 = tpu.matmul %7, %17, %cst_9 {dimension_numbers = #tpu.dot_dimension_numbers<[1], [0], [0], [1], [0, 0, 1, 1], [], []>} : vector<8x16xf32>, vector<16x32xf32>, vector<8x32xf32> -> vector<8x32xf32>
    %c48 = arith.constant 48 : index
    %c0_10 = arith.constant 0 : index
    %19 = vector.load %arg2[%c48, %c0_10] : memref<184x32xf32, #tpu.memory_space<vmem>>, vector<64x32xf32>
    %cst_11 = arith.constant dense<0.000000e+00> : vector<8x32xf32>
    %20 = tpu.matmul %12, %19, %cst_11 {dimension_numbers = #tpu.dot_dimension_numbers<[1], [0], [0], [1], [0, 0, 1, 1], [], []>} : vector<8x64xf32>, vector<64x32xf32>, vector<8x32xf32> -> vector<8x32xf32>
    %c112 = arith.constant 112 : index
    %c0_12 = arith.constant 0 : index
    %21 = vector.load %arg2[%c112, %c0_12] : memref<184x32xf32, #tpu.memory_space<vmem>>, vector<5x32xf32>
    %22 = vector.extract_strided_slice %21 {offsets = [0, 0], sizes = [2, 32], strides = [1, 1]} : vector<5x32xf32> to vector<2x32xf32>
    %23 = vector.extract_strided_slice %21 {offsets = [2, 0], sizes = [2, 32], strides = [1, 1]} : vector<5x32xf32> to vector<2x32xf32>
    %24 = vector.extract_strided_slice %21 {offsets = [4, 0], sizes = [1, 32], strides = [1, 1]} : vector<5x32xf32> to vector<1x32xf32>
    %25 = vector.extract_strided_slice %0 {offsets = [0, 0], sizes = [8, 1], strides = [1, 1]} : vector<8x2xf32> to vector<8x1xf32>
    %26 = vector.extract_strided_slice %22 {offsets = [0, 0], sizes = [1, 32], strides = [1, 1]} : vector<2x32xf32> to vector<1x32xf32>
    %27 = vector.broadcast %25 : vector<8x1xf32> to vector<8x32xf32>
    %28 = vector.broadcast %26 : vector<1x32xf32> to vector<8x32xf32>
    %29 = arith.mulf %27, %28 : vector<8x32xf32>
    %30 = vector.extract_strided_slice %0 {offsets = [0, 1], sizes = [8, 1], strides = [1, 1]} : vector<8x2xf32> to vector<8x1xf32>
    %31 = vector.extract_strided_slice %22 {offsets = [1, 0], sizes = [1, 32], strides = [1, 1]} : vector<2x32xf32> to vector<1x32xf32>
    %32 = vector.broadcast %30 : vector<8x1xf32> to vector<8x32xf32>
    %33 = vector.broadcast %31 : vector<1x32xf32> to vector<8x32xf32>
    %34 = arith.mulf %32, %33 : vector<8x32xf32>
    %35 = arith.addf %29, %34 : vector<8x32xf32>
    %36 = arith.addf %35, %14 : vector<8x32xf32>
    %37 = arith.addf %36, %20 : vector<8x32xf32>
    %cst_13 = arith.constant 0.000000e+00 : f32
    %38 = vector.broadcast %cst_13 : f32 to vector<8x32xf32>
    %39 = arith.maximumf %37, %38 : vector<8x32xf32>
    %c120 = arith.constant 120 : index
    %c0_14 = arith.constant 0 : index
    %40 = vector.load %arg2[%c120, %c0_14] : memref<184x32xf32, #tpu.memory_space<vmem>>, vector<32x32xf32>
    %cst_15 = arith.constant dense<0.000000e+00> : vector<8x32xf32>
    %41 = tpu.matmul %39, %40, %cst_15 {dimension_numbers = #tpu.dot_dimension_numbers<[1], [0], [0], [1], [0, 0, 1, 1], [], []>} : vector<8x32xf32>, vector<32x32xf32>, vector<8x32xf32> -> vector<8x32xf32>
    %42 = arith.addf %41, %16 : vector<8x32xf32>
    %cst_16 = arith.constant 0.000000e+00 : f32
    %43 = vector.broadcast %cst_16 : f32 to vector<8x32xf32>
    %44 = arith.maximumf %42, %43 : vector<8x32xf32>
    %c152 = arith.constant 152 : index
    %c0_17 = arith.constant 0 : index
    %45 = vector.load %arg2[%c152, %c0_17] : memref<184x32xf32, #tpu.memory_space<vmem>>, vector<32x32xf32>
    %cst_18 = arith.constant dense<0.000000e+00> : vector<8x32xf32>
    %46 = tpu.matmul %44, %45, %cst_18 {dimension_numbers = #tpu.dot_dimension_numbers<[1], [0], [0], [1], [0, 0, 1, 1], [], []>} : vector<8x32xf32>, vector<32x32xf32>, vector<8x32xf32> -> vector<8x32xf32>
    %47 = arith.addf %46, %18 : vector<8x32xf32>
    %cst_19 = arith.constant 0.000000e+00 : f32
    %48 = vector.broadcast %cst_19 : f32 to vector<8x32xf32>
    %49 = arith.maximumf %47, %48 : vector<8x32xf32>
    %50 = vector.extract_strided_slice %23 {offsets = [0, 0], sizes = [1, 32], strides = [1, 1]} : vector<2x32xf32> to vector<1x32xf32>
    %51 = vector.broadcast %50 : vector<1x32xf32> to vector<8x32xf32>
    %52 = arith.mulf %49, %51 : vector<8x32xf32>
    %cst_20 = arith.constant dense<0.000000e+00> : vector<8xf32>
    %53 = vector.multi_reduction <add>, %52, %cst_20 [1] : vector<8x32xf32> to vector<8xf32>
    %54 = vector.shape_cast %53 : vector<8xf32> to vector<8x1xf32>
    %55 = vector.extract_strided_slice %24 {offsets = [0, 0], sizes = [1, 1], strides = [1, 1]} : vector<1x32xf32> to vector<1x1xf32>
    %56 = vector.broadcast %55 : vector<1x1xf32> to vector<8x1xf32>
    %57 = arith.addf %54, %56 : vector<8x1xf32>
    %58 = vector.extract_strided_slice %23 {offsets = [1, 0], sizes = [1, 32], strides = [1, 1]} : vector<2x32xf32> to vector<1x32xf32>
    %59 = vector.broadcast %58 : vector<1x32xf32> to vector<8x32xf32>
    %60 = arith.mulf %49, %59 : vector<8x32xf32>
    %cst_21 = arith.constant dense<0.000000e+00> : vector<8xf32>
    %61 = vector.multi_reduction <add>, %60, %cst_21 [1] : vector<8x32xf32> to vector<8xf32>
    %62 = vector.shape_cast %61 : vector<8xf32> to vector<8x1xf32>
    %63 = vector.extract_strided_slice %24 {offsets = [0, 1], sizes = [1, 1], strides = [1, 1]} : vector<1x32xf32> to vector<1x1xf32>
    %64 = vector.broadcast %63 : vector<1x1xf32> to vector<8x1xf32>
    %65 = arith.addf %62, %64 : vector<8x1xf32>
    %c0_22 = arith.constant 0 : index
    %c0_23 = arith.constant 0 : index
    %66 = vector.load %arg3[%c0_22, %c0_23] : memref<8x2xf32, #tpu.memory_space<vmem>>, vector<8x1xf32>
    tpu.vector_store %arg3[%c0_22, %c0_23], %57 {strides = array<i32>} : memref<8x2xf32, #tpu.memory_space<vmem>>, vector<8x1xf32>,
    %c0_24 = arith.constant 0 : index
    %c1_25 = arith.constant 1 : index
    %67 = vector.load %arg3[%c0_24, %c1_25] : memref<8x2xf32, #tpu.memory_space<vmem>>, vector<8x1xf32>
    tpu.vector_store %arg3[%c0_24, %c1_25], %65 {strides = array<i32>} : memref<8x2xf32, #tpu.memory_space<vmem>>, vector<8x1xf32>,
    return
  }
}

</mosaic_0001>

<bundles_post_ra>
// kernel: tpu_custom_call.1
= control target key start
LH: loop header
LB: loop body
LE: loop exit
PB: predicated region body
PF: predicated region fallthrough
CT: control target
= control target key end

     0   :  { %v649_v0 = vmov 0   ;;  %v650_v2 = vmov 0.0   ;;  %v651_v7 = vmov 1   ;;  %vm652_vm0 = vmmov 0   ;;  %s797_s1 = inlined_call_operand.vmem [shape: s32[8,2], index: 1, kind: input, shape index: {}]   ;;  %s798_s2 = inlined_call_operand.vmem [shape: f32[184,32], index: 2, kind: input, shape index: {}]   ;;  %s799_s0 = inlined_call_operand.vmem [shape: f32[8,2], index: 0, kind: input, shape index: {}]   ;;  %s800_s3 = inlined_call_operand.vmem [shape: f32[8,2], index: 3, kind: output, shape index: {}]  }
   0x1   :  { %645 = vset.pattern.permute.xlu0 %v649_v0  ;;  %v15_v1 = vld [vmem:[%s797_s1] sm:$0xff]  ;;  %586 = vmatprep.subr.mxu1 %v650_v2  ;;  %v107_v3 = vld [vmem:[%s798_s2 + $0x18] sm:$0xff]  ;;  %v31_v4 = vld [vmem:[%s798_s2 + $0x8] sm:$0xff]  ;;  %v16_v9 = vlaneseq  ;;  %vm32_vm1 = vcmask 130048   ;;  %vm258_vm4 = vcmask 523264   ;;  %vm360_vm5 = vcmask 261120  }
   0x2   :  { %19 = vperm.xlu0 %645, %v15_v1   ;;  %579 = vmatprep.subr.mxu0 %v650_v2  ;;  %v106_v5 = vld [vmem:[%s798_s2 + $0x10] sm:$0xff]  ;;  %v30_v6 = vld [vmem:[%s798_s2] sm:$0xff]  ;;  %v257_v12 = vld [vmem:[%s798_s2 + $0x68] sm:$0xff]  ;;  %vm535_vm6 = vcmask 7168   ;;  %vm537_vm7 = vcmask 15368  }
   0x3   :  { %587 = vmatpush3.msra.mxu1 %v107_v3  ;;  %580 = vmatpush3.msra.mxu0 %v31_v4  ;;  %v14_v8 = vld [vmem:[%s799_s0] sm:$0xff]  ;;  %v17_v10 = vand.u32 127, %v16_v9  ;;  %v179_v13 = vld [vmem:[%s798_s2 + $0x28] sm:$0xff]  ;;  %v255_v17 = vld [vmem:[%s798_s2 + $0x58] sm:$0xff]  ;;  %v339_v29 = vshrl.u32 %v16_v9, 7 }
   0x4   :  { %588 = vmatprep.subr.mxu1 %v650_v2  ;;  %581 = vmatprep.subr.mxu0 %v650_v2  ;;  %v256_v15 = vld [vmem:[%s798_s2 + $0x60] sm:$0xff]  ;;  %v254_v18 = vld [vmem:[%s798_s2 + $0x50] sm:$0xff]  ;;  %v253_v19 = vld [vmem:[%s798_s2 + $0x48] sm:$0xff] }
   0x5   :  { %589 = vmatpush3.msra.mxu1 %v106_v5  ;;  %582 = vmatpush3.msra.mxu0 %v30_v6  ;;  %v178_v16 = vld [vmem:[%s798_s2 + $0x20] sm:$0xff]  ;;  %v251_v22 = vld [vmem:[%s798_s2 + $0x38] sm:$0xff]  ;;  %v250_v23 = vld [vmem:[%s798_s2 + $0x30] sm:$0xff]  ;;  %v340_v31 = vsub.s32 0, %v339_v29  ;;  %v349_v32 = vsub.s32 1, %v339_v29  ;;  %v528_v59 = vsub.s32 3, %v339_v29 }
   0x6   :  { %646 = vset.pattern.permute.xlu0 %v651_v7  ;;  %583 = vmatprep.mubr.msk.f32.mxu0 %vm652_vm0, %v650_v2  ;;  %v252_v21 = vld [vmem:[%s798_s2 + $0x40] sm:$0xff]  ;;  %v359_v25 = vld [vmem:[%s798_s2 + $0x90] sm:$0xff]  ;;  %v358_v26 = vld [vmem:[%s798_s2 + $0x88] sm:$0xff]  ;;  %v515_v60 = vsub.s32 2, %v339_v29 }
   0x7   :  { %25 = vperm.xlu0 %646, %v15_v1   ;;  %590 = vmatprep.mubr.msk.f32.mxu1 %vm652_vm0, %v650_v2  ;;  %v357_v27 = vld [vmem:[%s798_s2 + $0x80] sm:$0xff]  ;;  %v356_v28 = vld [vmem:[%s798_s2 + $0x78] sm:$0xff]  ;;  %v332_v33 = vld [vmem:[%s798_s2 + $0x70] sm:$0x1f] }
   0x8   :  { %600 = vmatprep.subr.mxu1 %v650_v2  ;;  %593 = vmatprep.subr.mxu0 %v650_v2  ;;  %v341_v38 = vrot.slane %v332_v33, %v340_v31  ;;  %v350_v39 = vrot.slane %v332_v33, %v349_v32  ;;  %v438_v51 = vld [vmem:[%s798_s2 + $0xb0] sm:$0xff]  ;;  %v437_v52 = vld [vmem:[%s798_s2 + $0xa8] sm:$0xff]  ;;  %v436_v53 = vld [vmem:[%s798_s2 + $0xa0] sm:$0xff]  ;;  %v529_v63 = vrot.slane %v332_v33, %v528_v59 }
   0x9   :  { %647 = vset.pattern.permute.xlu1 %v649_v0  ;;  %v435_v54 = vld [vmem:[%s798_s2 + $0x98] sm:$0xff]  ;;  %v516_v0 = vrot.slane %v332_v33, %v515_v60 }
   0xa   :  { %335 = vperm.xlu1 %647, %v14_v8  }
   0xe   :  { %648 = vset.pattern.permute.xlu1 %v651_v7  ;;  %v523_v7 = vsub.s32 4, %v339_v29 }
   0xf   :  { %344 = vperm.xlu1 %648, %v14_v8  }
  0x10   :  { %v524_v8 = vrot.slane %v332_v33, %v523_v7 }
  0x7d   :  { %v20_v11 = vpop.permute.xlu0 %19 }
  0x7e   :  { %vm21_vm2 = vcmp.eq.s32.totalorder %v17_v10, %v20_v11 }
  0x7f   :  { %v543_v14 = vsel %vm21_vm2, 1.0, %v650_v2 }
  0x80   :  { %584 = vmatmul.mubr.msk.f32.vlgmr.msra.gmra.mxu0 %vm32_vm1, %v543_v14  ;;  %591 = vmatmul.mubr.msk.f32.vlgmr.msra.gmra.mxu1 %vm32_vm1, %v543_v14 }
  0x81   :  { %601 = vmatpush3.msra.mxu1 %v257_v12  ;;  %594 = vmatpush3.msra.mxu0 %v179_v13 }
  0x82   :  { %602 = vmatprep.subr.mxu1 %v650_v2  ;;  %595 = vmatprep.subr.mxu0 %v650_v2  ;;  %v26_v20 = vpop.permute.xlu0 %25 }
  0x83   :  { %603 = vmatpush3.msra.mxu1 %v256_v15  ;;  %596 = vmatpush3.msra.mxu0 %v178_v16  ;;  %vm27_vm3 = vcmp.eq.s32.totalorder %v17_v10, %v26_v20 }
  0x84   :  { %597 = vmatprep.mubr.msk.f32.mxu0 %vm652_vm0, %v650_v2  ;;  %604 = vmatprep.subr.mxu1 %v650_v2  ;;  %v544_v24 = vsel %vm27_vm3, 1.0, %v650_v2 }
  0x85   :  { %598 = vmatmul.mubr.msk.f32.vlgmr.msra.gmra.mxu0 %vm32_vm1, %v543_v14  ;;  %605 = vmatpush3.msra.mxu1 %v255_v17  ;;  %v336_v30 = vpop.permute.xlu1 %335 }
  0x86   :  { %606 = vmatprep.subr.mxu1 %v650_v2  ;;  %616 = vmatprep.mubr.msk.f32.mxu1 %vm652_vm0, %v650_v2  ;;  %v342_v42 = vmul.f32 %v341_v38, %v336_v30 }
  0x87   :  { %607 = vmatpush3.msra.mxu1 %v254_v18  ;;  %619 = vmatprep.subr.mxu0 %v650_v2 }
  0x88   :  { %608 = vmatprep.subr.mxu1 %v650_v2  ;;  %627 = vmatprep.mubr.msk.f32.mxu0 %vm652_vm0, %v650_v2 }
  0x89   :  { %609 = vmatpush3.msra.mxu1 %v253_v19  ;;  %620 = vmatpush3.msra.mxu0 %v359_v25 }
  0x8a   :  { %610 = vmatprep.subr.mxu1 %v650_v2  ;;  %621 = vmatprep.subr.mxu0 %v650_v2  ;;  %v345_v40 = vpop.permute.xlu1 %344 }
  0x8b   :  { %611 = vmatpush3.msra.mxu1 %v252_v21  ;;  %622 = vmatpush3.msra.mxu0 %v358_v26  ;;  %v351_v43 = vmul.f32 %v350_v39, %v345_v40 }
  0x8c   :  { %612 = vmatprep.subr.mxu1 %v650_v2  ;;  %623 = vmatprep.subr.mxu0 %v650_v2 }
  0x8d   :  { %613 = vmatpush3.msra.mxu1 %v251_v22  ;;  %624 = vmatpush3.msra.mxu0 %v357_v27  ;;  %v352_v45 = vadd.f32 %v351_v43, %v342_v42 }
  0x8e   :  { %614 = vmatprep.subr.mxu1 %v650_v2  ;;  %625 = vmatprep.subr.mxu0 %v650_v2 }
  0x8f   :  { %615 = vmatpush3.msra.mxu1 %v250_v23  ;;  %626 = vmatpush3.msra.mxu0 %v356_v28 }
  0x90   :  { %617 = vmatmul.mubr.msk.f32.vlgmr.msra.gmra.mxu1 %vm258_vm4, %v544_v24  ;;  %630 = vmatprep.subr.mxu0 %v650_v2 }
 0x140   :  { %v102_v34 = vpop.f32.mrf.mxu0  ;;  %v174_v35 = vpop.f32.mrf.mxu1 }
 0x141   :  { %v353_v46 = vadd.f32 %v352_v45, %v102_v34 }
 0x142   :  { %v585_v36 = vpop.f32.mrf.mxu0  ;;  %v592_v37 = vpop.f32.mrf.mxu1 }
 0x145   :  { %v246_v41 = vpop.f32.mrf.mxu0 }
 0x147   :  { %v599_v44 = vpop.f32.mrf.mxu0 }
 0x150   :  { %v328_v47 = vpop.f32.mrf.mxu1 }
 0x151   :  { %v354_v48 = vadd.f32 %v353_v46, %v328_v47 }
 0x152   :  { %v618_v49 = vpop.f32.mrf.mxu1 }
 0x153   :  { %v355_v50 = vmax.f32 %v354_v48, 0.0 }
 0x155   :  { %628 = vmatmul.mubr.msk.f32.vlgmr.msra.gmra.mxu0 %vm360_vm5, %v355_v50 }
 0x156   :  { %631 = vmatpush3.msra.mxu0 %v438_v51  ;;  %638 = vmatprep.mubr.msk.f32.mxu0 %vm652_vm0, %v650_v2 }
 0x157   :  { %632 = vmatprep.subr.mxu0 %v650_v2 }
 0x158   :  { %633 = vmatpush3.msra.mxu0 %v437_v52 }
 0x159   :  { %634 = vmatprep.subr.mxu0 %v650_v2 }
 0x15a   :  { %635 = vmatpush3.msra.mxu0 %v436_v53 }
 0x15b   :  { %636 = vmatprep.subr.mxu0 %v650_v2 }
 0x15c   :  { %637 = vmatpush3.msra.mxu0 %v435_v54 }
 0x215   :  { %v430_v55 = vpop.f32.mrf.mxu0 }
 0x216   :  { %v431_v56 = vadd.f32 %v430_v55, %v174_v35 }
 0x217   :  { %v629_v57 = vpop.f32.mrf.mxu0 }
 0x218   :  { %v434_v58 = vmax.f32 %v431_v56, 0.0 }
 0x21a   :  { %639 = vmatmul.mubr.msk.f32.vlgmr.msra.gmra.mxu0 %vm360_vm5, %v434_v58 }
 0x2da   :  { %v508_v61 = vpop.f32.mrf.mxu0 }
 0x2db   :  { %v509_v62 = vadd.f32 %v508_v61, %v246_v41 }
 0x2dc   :  { %v640_v1 = vpop.f32.mrf.mxu0 }
 0x2dd   :  { %v512_v3 = vmax.f32 %v509_v62, 0.0 }
 0x2df   :  { %v530_v2 = vmul.f32 %v529_v63, %v512_v3  ;;  %v517_v4 = vmul.f32 %v516_v0, %v512_v3 }
 0x2e1   :  { %v531_v5 = vsel %vm360_vm5, %v530_v2, 0.0  ;;  %v518_v6 = vsel %vm360_vm5, %v517_v4, 0.0 }
 0x2e2   :  { %532 = vadd.xlane.f32.xlu0 %v531_v5  ;;  %519 = vadd.xlane.f32.xlu1 %v518_v6 }
 0x36b   :  { %v533_v9 = vpop.xlane.xlu0 %532  ;;  %v520_v10 = vpop.xlane.xlu1 %519 }
 0x36c   :  { %v534_v11 = vadd.f32 %v533_v9, %v524_v8  ;;  %v525_v12 = vadd.f32 %v524_v8, %v520_v10 }
 0x36e   :  { %536 = vst.msk [vmem:[%s800_s3] sm:$0xff] %vm535_vm6, %v525_v12 }
 0x36f   :  { %538 = vst.msk [vmem:[%s800_s3] sm:$0xff] %vm537_vm7, %v534_v11 }

</bundles_post_ra>
